<compile_context>
chip_gen: v5e
topology: v5e:2x2
jax: 0.10.0
libtpu: 0.0.40
codegen_flags: <defaults>
</compile_context>

<pallas_src>
from functools import lru_cache, partial

import numpy as np
import jax
import jax.numpy as jnp
from jax.experimental import pallas as pl
from jax.experimental.pallas import tpu as pltpu


# ----------------------------- Pallas kernel -------------------------------

def _resize_bbox_kernel(img_ref, wy_ref, wxtb_ref, bbox_ref,
                        img_out_ref, bbox_out_ref, *, scale_x, scale_y):
    # img_ref     : (H_in,  C*W_in)   bf16   image as a lane-dense slab
    # wy_ref      : (H_out, H_in)     bf16   height interpolation matrix
    # wxtb_ref    : (C*W_in, C*W_out) bf16   block-diagonal Wx^T
    # bbox_ref    : (N, 4)                   boxes (x1, y1, x2, y2)
    # img_out_ref : (H_out, C*W_out)  f32    lane-dense output slab
    # bbox_out_ref: (N, 4)
    y = jnp.dot(wy_ref[...], img_ref[...],
                preferred_element_type=jnp.float32)             # (H_out, C*W_in)
    img_out_ref[...] = jnp.dot(
        y.astype(jnp.bfloat16), wxtb_ref[...],
        preferred_element_type=jnp.float32).astype(img_out_ref.dtype)

    # bbox rescale: columns (x1, y1, x2, y2) scale by (sx, sy, sx, sy).
    cols = jax.lax.broadcasted_iota(jnp.int32, bbox_ref.shape, dimension=1)
    scale = jnp.where(cols % 2 == 0, jnp.float32(scale_x), jnp.float32(scale_y))
    bbox_out_ref[...] = jnp.round(
        bbox_ref[...].astype(jnp.float32) * scale).astype(bbox_out_ref.dtype)


# --------------------------- interpolation setup ----------------------------

def _bilinear_matrix(out_size: int, in_size: int) -> np.ndarray:
    """Separable bilinear interpolation matrix, half-pixel centers."""
    dst = np.arange(out_size, dtype=np.float64)
    src = (dst + 0.5) * (in_size / out_size) - 0.5
    src = np.clip(src, 0.0, in_size - 1)
    lo = np.floor(src).astype(np.int64)
    hi = np.minimum(lo + 1, in_size - 1)
    frac = src - lo
    mat = np.zeros((out_size, in_size), dtype=np.float64)
    mat[np.arange(out_size), lo] += 1.0 - frac
    mat[np.arange(out_size), hi] += frac
    return mat.astype(np.float32)


@lru_cache(maxsize=None)
def _interp_matrices(height, width, old_height, old_width, channels):
    """Cached device-resident bf16 interpolation matrices.

    Returns (Wy, blockdiag_C(Wx^T)) so the whole resize is two lane-dense
    matmuls on the (H, C*W) slab.  Built on host + uploaded once per shape.
    """
    wy = _bilinear_matrix(height, old_height)                  # (H_out, H_in)
    wxt = _bilinear_matrix(width, old_width).T                 # (W_in, W_out)
    wxt_blk = np.zeros((channels * old_width, channels * width), np.float32)
    for c in range(channels):
        wxt_blk[c * old_width:(c + 1) * old_width,
                c * width:(c + 1) * width] = wxt
    return (jnp.asarray(wy, dtype=jnp.bfloat16),
            jnp.asarray(wxt_blk, dtype=jnp.bfloat16))


# --------------------------------- glue ------------------------------------

@partial(jax.jit, static_argnames=("height", "width"))
def _resize_call(img, bboxes, wy, wxt_blk, *, height, width):
    C, H_in, W_in = img.shape
    scale_x = float(width) / float(W_in)
    scale_y = float(height) / float(H_in)

    # Lane-dense slab: (C, H, W) -> (H, C*W), cast to bf16 at the boundary.
    img_slab = (jnp.transpose(img, (1, 0, 2))
                   .reshape(H_in, C * W_in)
                   .astype(jnp.bfloat16))

    kernel = partial(_resize_bbox_kernel, scale_x=scale_x, scale_y=scale_y)
    vmem = pl.BlockSpec(memory_space=pltpu.MemorySpace.VMEM)

    img_flat, bbox_out = pl.pallas_call(
        kernel,
        out_shape=(
            jax.ShapeDtypeStruct((height, C * width), img.dtype),
            jax.ShapeDtypeStruct(bboxes.shape, bboxes.dtype),
        ),
        in_specs=[vmem, vmem, vmem, vmem],
        out_specs=(vmem, vmem),
    )(img_slab, wy, wxt_blk, bboxes)

    img_out = img_flat.reshape(height, C, width).transpose(1, 0, 2)   # back to CHW
    return img_out, bbox_out


class Resize:
    """JAX/Pallas port of the PyTorch Resize transform (bilinear + bbox scale)."""

    def __init__(self, size=(448, 448)):
        # size follows the PyTorch module convention: (width, height)
        self.size = size

    def __call__(self, img: jax.Array, bboxes: jax.Array):
        width, height = self.size
        C, old_height, old_width = img.shape
        wy, wxt_blk = _interp_matrices(height, width, old_height, old_width, C)
        return _resize_call(img, bboxes, wy, wxt_blk, height=height, width=width)


# --------------------------------- main -------------------------------------

if __name__ == "__main__":
    key = jax.random.PRNGKey(0)
    k_img, k_box = jax.random.split(key)

    C, H_in, W_in = 4, 16, 16
    img = jax.random.uniform(k_img, (C, H_in, W_in), dtype=jnp.float32) * 255.0

    N_boxes = 8
    bboxes = jax.random.uniform(k_box, (N_boxes, 4), dtype=jnp.float32) * 16.0

    W_out, H_out = 32, 24
    resize = Resize(size=(W_out, H_out))          # (width, height)
    img_out, bboxes_out = resize(img, bboxes)
    jax.block_until_ready(img_out)
    jax.block_until_ready(bboxes_out)

    # ---- sanity checks against an exact host (float64) bilinear reference ----
    assert img_out.shape == (C, H_out, W_out)
    wy_np = _bilinear_matrix(H_out, H_in).astype(np.float64)
    wx_np = _bilinear_matrix(W_out, W_in).astype(np.float64)
    ref_img = np.einsum('oh,chw,pw->cop', wy_np,
                        np.asarray(img, np.float64), wx_np)
    # bf16 operand/intermediate rounding on 0..255-range pixels bounds the
    # error well under 2.5.
    max_err = float(np.max(np.abs(np.asarray(img_out, np.float64) - ref_img)))
    assert max_err < 2.5, max_err

    sx = np.float32(W_out / W_in)
    sy = np.float32(H_out / H_in)
    ref_box = np.rint(np.asarray(bboxes) * np.array([sx, sy, sx, sy], np.float32))
    assert np.allclose(np.asarray(bboxes_out), ref_box)

    print("KERNEL_OK")
</pallas_src>

<mosaic_0001>
module attributes {stable_mosaic.version = 11 : i64} {
  func.func @_resize_bbox_kernel(%arg0: memref<16x64xbf16, #tpu.memory_space<vmem>>, %arg1: memref<24x16xbf16, #tpu.memory_space<vmem>>, %arg2: memref<64x128xbf16, #tpu.memory_space<vmem>>, %arg3: memref<8x4xf32, #tpu.memory_space<vmem>>, %arg4: memref<24x128xf32, #tpu.memory_space<vmem>>, %arg5: memref<8x4xf32, #tpu.memory_space<vmem>>) attributes {dimension_semantics = [], scalar_prefetch = 0 : i64, scratch_operands = 0 : i64, tpu.core_type = #tpu.core_type<tc>} {
    %c0 = arith.constant 0 : index
    %c0_0 = arith.constant 0 : index
    %0 = vector.load %arg1[%c0, %c0_0] : memref<24x16xbf16, #tpu.memory_space<vmem>>, vector<24x16xbf16>
    %c0_1 = arith.constant 0 : index
    %c0_2 = arith.constant 0 : index
    %1 = vector.load %arg0[%c0_1, %c0_2] : memref<16x64xbf16, #tpu.memory_space<vmem>>, vector<16x64xbf16>
    %cst = arith.constant dense<0.000000e+00> : vector<24x64xf32>
    %2 = tpu.matmul %0, %1, %cst {dimension_numbers = #tpu.dot_dimension_numbers<[1], [0], [0], [1], [0, 0, 1, 1], [], []>} : vector<24x16xbf16>, vector<16x64xbf16>, vector<24x64xf32> -> vector<24x64xf32>
    %3 = arith.truncf %2 : vector<24x64xf32> to vector<24x64xbf16>
    %c0_3 = arith.constant 0 : index
    %c0_4 = arith.constant 0 : index
    %4 = vector.load %arg2[%c0_3, %c0_4] : memref<64x128xbf16, #tpu.memory_space<vmem>>, vector<64x128xbf16>
    %cst_5 = arith.constant dense<0.000000e+00> : vector<24x128xf32>
    %5 = tpu.matmul %3, %4, %cst_5 {dimension_numbers = #tpu.dot_dimension_numbers<[1], [0], [0], [1], [0, 0, 1, 1], [], []>} : vector<24x64xbf16>, vector<64x128xbf16>, vector<24x128xf32> -> vector<24x128xf32>
    %c0_6 = arith.constant 0 : index
    %c0_7 = arith.constant 0 : index
    %6 = vector.load %arg4[%c0_6, %c0_7] : memref<24x128xf32, #tpu.memory_space<vmem>>, vector<24x128xf32>
    tpu.vector_store %arg4[%c0_6, %c0_7], %5 {strides = array<i32>} : memref<24x128xf32, #tpu.memory_space<vmem>>, vector<24x128xf32>,
    %7 = tpu.iota {dimensions = array<i32: 1>} : vector<8x4xi32>
    %c2_i32 = arith.constant 2 : i32
    %c0_i32 = arith.constant 0 : i32
    %8 = arith.cmpi eq, %c2_i32, %c0_i32 : i32
    %c1_i32 = arith.constant 1 : i32
    %9 = arith.select %8, %c1_i32, %c2_i32 : i32
    %10 = vector.broadcast %9 : i32 to vector<8x4xi32>
    %11 = arith.remsi %7, %10 : vector<8x4xi32>
    %c0_i32_8 = arith.constant 0 : i32
    %12 = vector.broadcast %c0_i32_8 : i32 to vector<8x4xi32>
    %13 = arith.cmpi ne, %11, %12 : vector<8x4xi32>
    %c0_i32_9 = arith.constant 0 : i32
    %14 = vector.broadcast %c0_i32_9 : i32 to vector<8x4xi32>
    %15 = arith.cmpi slt, %11, %14 : vector<8x4xi32>
    %c0_i32_10 = arith.constant 0 : i32
    %16 = arith.cmpi slt, %9, %c0_i32_10 : i32
    %17 = vector.broadcast %16 : i1 to vector<8x4xi1>
    %18 = vector.broadcast %17 : vector<8x4xi1> to vector<8x4xi1>
    %19 = arith.xori %15, %18 : vector<8x4xi1>
    %20 = arith.andi %19, %13 : vector<8x4xi1>
    %21 = vector.broadcast %9 : i32 to vector<8x4xi32>
    %22 = arith.addi %11, %21 : vector<8x4xi32>
    %23 = arith.select %20, %22, %11 : vector<8x4xi1>, vector<8x4xi32>
    %c0_i32_11 = arith.constant 0 : i32
    %24 = vector.broadcast %c0_i32_11 : i32 to vector<8x4xi32>
    %25 = arith.cmpi eq, %23, %24 : vector<8x4xi32>
    %cst_12 = arith.constant 2.000000e+00 : f32
    %cst_13 = arith.constant 1.500000e+00 : f32
    %26 = vector.broadcast %cst_12 : f32 to vector<8x4xf32>
    %27 = vector.broadcast %cst_13 : f32 to vector<8x4xf32>
    %28 = arith.select %25, %26, %27 : vector<8x4xi1>, vector<8x4xf32>
    %c0_14 = arith.constant 0 : index
    %c0_15 = arith.constant 0 : index
    %29 = vector.load %arg3[%c0_14, %c0_15] : memref<8x4xf32, #tpu.memory_space<vmem>>, vector<8x4xf32>
    %30 = arith.mulf %29, %28 : vector<8x4xf32>
    %31 = math.roundeven %30 : vector<8x4xf32>
    %c0_16 = arith.constant 0 : index
    %c0_17 = arith.constant 0 : index
    %32 = vector.load %arg5[%c0_16, %c0_17] : memref<8x4xf32, #tpu.memory_space<vmem>>, vector<8x4xf32>
    tpu.vector_store %arg5[%c0_16, %c0_17], %31 {strides = array<i32>} : memref<8x4xf32, #tpu.memory_space<vmem>>, vector<8x4xf32>,
    return
  }
}

</mosaic_0001>

<bundles_post_ra>
// kernel: _resize_call.1
= control target key start
LH: loop header
LB: loop body
LE: loop exit
PB: predicated region body
PF: predicated region fallthrough
CT: control target
= control target key end

     0   :  { %vm39_vm0 = vcmask 130048   ;;  %vm98_vm1 = vcmask 523264   ;;  %v126_v15 = vlaneseq  ;;  %v203_v18 = vmov 1.5   ;;  %s270_s0 = inlined_call_operand.vmem [shape: bf16[16,64], index: 0, kind: input, shape index: {}]   ;;  %s271_s1 = inlined_call_operand.vmem [shape: bf16[24,16], index: 1, kind: input, shape index: {}]   ;;  %s272_s2 = inlined_call_operand.vmem [shape: bf16[64,128], index: 2, kind: input, shape index: {}]   ;;  %s273_s3 = inlined_call_operand.vmem [shape: f32[8,4], index: 3, kind: input, shape index: {}]   ;;  %s274_s5 = inlined_call_operand.vmem [shape: f32[8,4], index: 5, kind: output, shape index: {1}]   ;;  %s275_s4 = inlined_call_operand.vmem [shape: f32[24,128], index: 4, kind: output, shape index: {0}]  }
   0x1   :  { %v184_v0 = vld [vmem:[%s270_s0] sm:$0xff]  ;;  %v22_v1 = vld [vmem:[%s271_s1 + $0x8] sm:$0xf]  ;;  %v188_v4 = vld [vmem:[%s272_s2 + $0x18] sm:$0xff]  ;;  %vm145_vm4 = vcmask 31744  }
   0x2   :  { %v183_v2 = vld [vmem:[%s271_s1] sm:$0xff]  ;;  %v30_v3 = vunpack.c.l.b16 %v22_v1  ;;  %53 = vmatpush.bf16.msra.mxu0 %v184_v0  ;;  %189 = vmatpush.bf16.msra.mxu3 %v184_v0  ;;  %v187_v6 = vld [vmem:[%s272_s2 + $0x10] sm:$0xff]  ;;  %v186_v7 = vld [vmem:[%s272_s2 + $0x8] sm:$0xff]  ;;  %v127_v16 = vand.u32 127, %v126_v15 }
   0x3   :  { %190 = vmatpush.bf16.msra.mxu2 %v188_v4  ;;  %109 = vmatpush.bf16.msra.mxu1 %v188_v4  ;;  %v185_v8 = vld [vmem:[%s272_s2] sm:$0xff] }
   0x4   :  { %v32_v5 = vpack.c.b16 %v30_v3, %v30_v3  ;;  %v132_v17 = vand.u32 1, %v127_v16  ;;  %v142_v20 = vld [vmem:[%s273_s3] sm:$0xff] }
   0x5   :  { %163 = vmatmul.msk.bf16.vlgmr.msra.gmra.mxu0 %vm39_vm0, %v183_v2 }
   0x6   :  { %164 = vmatmul.msk.bf16.vlgmr.msra.gmra.mxu3 %vm39_vm0, %v32_v5  ;;  %vm140_vm2 = vcmp.eq.s32.totalorder %v132_v17, 0 }
   0x7   :  { %191 = vmatpush.bf16.msra.mxu2 %v187_v6  ;;  %110 = vmatpush.bf16.msra.mxu1 %v187_v6  ;;  %v141_v19 = vsel %vm140_vm2, 2.0, %v203_v18 }
   0x8   :  { %v143_v21 = vmul.f32 %v142_v20, %v141_v19 }
   0xa   :  { %v196_v22 = vcvt.f32.s32 %v143_v21  ;;  %v199_v25 = vand.u32 2147483648, %v143_v21  ;;  %v194_v26 = vand.u32 2147483647, %v143_v21 }
   0xb   :  { %192 = vmatpush.bf16.msra.mxu2 %v186_v7  ;;  %111 = vmatpush.bf16.msra.mxu1 %v186_v7 }
   0xc   :  { %v197_v23 = vcvt.s32.f32 %v196_v22  ;;  %vm195_vm3 = vcmp.lt.f32.partialorder %v194_v26, 8388608.0 }
   0xe   :  { %v198_v24 = vand.u32 2147483647, %v197_v23 }
   0xf   :  { %193 = vmatpush.bf16.msra.mxu2 %v185_v8  ;;  %112 = vmatpush.bf16.msra.mxu1 %v185_v8 }
  0x10   :  { %v200_v27 = vor.u32 %v199_v25, %v198_v24 }
  0x12   :  { %v201_v28 = vsel %vm195_vm3, %v200_v27, %v143_v21 }
  0x13   :  { %146 = vst.msk [vmem:[%s274_s5] sm:$0xff] %vm145_vm4, %v201_v28 }
  0x82   :  { %v55_v9 = vpop.f32.mrf.mxu0 }
  0x89   :  { %v60_v10 = vpop.f32.mrf.mxu3 }
  0x8a   :  { %v65_v11 = vpack.c.bf16 %v60_v10, %v60_v10  ;;  %v57_v12 = vpop.f32.mrf.mxu0 }
  0x8b   :  { %v64_v13 = vpack.c.bf16 %v57_v12, %v55_v9 }
  0x8c   :  { %182 = vmatmul.msk.bf16.vlgmr.msra.gmra.mxu2 %vm98_vm1, %v65_v11 }
  0x8d   :  { %181 = vmatmul.msk.bf16.vlgmr.msra.gmra.mxu1 %vm98_vm1, %v64_v13 }
  0x91   :  { %v62_v14 = vpop.f32.mrf.mxu3 }
 0x10a   :  { %v114_v29 = vpop.f32.mrf.mxu1 }
 0x10b   :  { %123 = vst [vmem:[%s275_s4] sm:$0xff] %v114_v29 }
 0x10f   :  { %v119_v30 = vpop.f32.mrf.mxu2 }
 0x110   :  { %125 = vst [vmem:[%s275_s4 + $0x10] sm:$0xff] %v119_v30 }
 0x112   :  { %v116_v31 = vpop.f32.mrf.mxu1 }
 0x113   :  { %124 = vst [vmem:[%s275_s4 + $0x8] sm:$0xff] %v116_v31 }
 0x117   :  { %v121_v32 = vpop.f32.mrf.mxu2 }

</bundles_post_ra>
